<compile_context>
chip_gen: v6e
topology: v6e:2x2x1
jax: 0.10.0
libtpu: 0.0.40
codegen_flags: <defaults>
</compile_context>

<pallas_src>
import functools

import jax
import jax.numpy as jnp
from jax import lax
from jax.experimental import pallas as pl
from jax.experimental.pallas import tpu as pltpu


IN_DIM = 22
H1, H2, H3 = 128, 64, 32


def mlp_kernel(x_ref,
               w1_ref, b1_ref,
               w2_ref, b2_ref,
               w3_ref, b3_ref,
               w4_ref, b4_ref,
               o_ref):
    """sigmoid(W4 @ relu(W3 @ relu(W2 @ relu(W1 @ x^T + b1) + b2) + b3) + b4).

    x block: (TB, 22) f32 (natural layout, batch on sublanes of the input tile).
    Weights: (out, in); w1 f32, w2/w3 bf16, w4 stored transposed (32, 1) f32.
    Biases: (out, 1) f32.  All hidden activations are (out, TB): batch on lanes.
    """
    # fc1: contract the feature dims of w1 (128, 22) and x (TB, 22) -> (128, TB).
    # f32 x f32 on the MXU (K=22 -> MXU has huge slack; keeps accuracy tight).
    h = lax.dot_general(w1_ref[...], x_ref[...],
                        (((1,), (1,)), ((), ())),
                        preferred_element_type=jnp.float32)
    h = jnp.maximum(h + b1_ref[...], 0.0).astype(jnp.bfloat16)      # (128, TB) bf16

    # fc2: (64, 128) bf16 @ (128, TB) bf16 -> (64, TB) f32 accumulation.
    h = jnp.dot(w2_ref[...], h, preferred_element_type=jnp.float32)
    h = jnp.maximum(h + b2_ref[...], 0.0).astype(jnp.bfloat16)      # (64, TB) bf16

    # fc3: (32, 64) bf16 @ (64, TB) bf16 -> (32, TB) f32.
    h = jnp.dot(w3_ref[...], h, preferred_element_type=jnp.float32)
    h = jnp.maximum(h + b3_ref[...], 0.0)                            # (32, TB) f32

    # fc4 (32 -> 1): VPU broadcast-multiply + XLU sublane reduce; an MXU matmul
    # with K=32, M=1 would be >99% padding.
    z = jnp.sum(h * w4_ref[...], axis=0, keepdims=True) + b4_ref[...]   # (1, TB)

    o_ref[...] = jax.nn.sigmoid(z).astype(o_ref.dtype)


def _round_up(n, m):
    return -(-n // m) * m


def _pick_tile(B, tb_max=2048):
    """Batch-tile heuristic: one right-sized 128-aligned tile for small B;
    otherwise an even number of <=tb_max tiles (multiples of 256) so v7x's two
    TensorCores both get work."""
    Bp = _round_up(max(B, 1), 128)
    if Bp <= tb_max:
        return Bp
    n_tiles = 2 * (-(-Bp // (2 * tb_max)))          # smallest even count with tile <= tb_max
    return _round_up(-(-Bp // n_tiles), 256)


@functools.partial(jax.jit, static_argnames=("tb",))
def _forward_jit(x, params, tb):
    (w1, b1), (w2, b2), (w3, b3), (w4, b4) = params
    B = x.shape[0]

    num_tiles = pl.cdiv(B, tb)
    Bp = num_tiles * tb

    x = x.astype(jnp.float32)
    if Bp != B:
        x = jnp.pad(x, ((0, Bp - B), (0, 0)))       # batch-pad only; no transpose/cast pass

    w2b = w2.astype(jnp.bfloat16)
    w3b = w3.astype(jnp.bfloat16)

    # Advisory cost estimate for XLA scheduling around the custom call.
    mm_flops_per_row = 2 * (IN_DIM * H1 + H1 * H2 + H2 * H3 + H3 * 1)
    weight_bytes = (4 * IN_DIM * H1 + 2 * (H1 * H2 + H2 * H3)
                    + 4 * (H1 + H2 + H3 + H3 + 1))
    cost = pl.CostEstimate(
        flops=mm_flops_per_row * Bp,
        transcendentals=Bp,
        bytes_accessed=IN_DIM * Bp * 4 + Bp * 4 + weight_bytes,
    )

    const_spec = lambda shape: pl.BlockSpec(shape, lambda i: (0, 0))

    out_t = pl.pallas_call(
        mlp_kernel,
        out_shape=jax.ShapeDtypeStruct((1, Bp), jnp.float32),
        grid=(num_tiles,),
        in_specs=[
            pl.BlockSpec((tb, IN_DIM), lambda i: (i, 0)),   # x: natural layout, batch-tiled
            const_spec(w1.shape), const_spec(b1.shape),     # weights/biases stay VMEM-resident
            const_spec(w2b.shape), const_spec(b2.shape),
            const_spec(w3b.shape), const_spec(b3.shape),
            const_spec(w4.shape), const_spec(b4.shape),
        ],
        out_specs=pl.BlockSpec((1, tb), lambda i: (0, i)),  # lane-dense output slab
        compiler_params=pltpu.CompilerParams(
            dimension_semantics=("parallel",)),
        cost_estimate=cost,
    )(x, w1, b1, w2b, b2, w3b, b3, w4, b4)

    return out_t[0, :B].reshape(B, 1)


def classification_model_forward(x, params, *, tb_max=2048):
    """x: (B, 22) float32 -> (B, 1) float32 in [0, 1]."""
    tb = _pick_tile(x.shape[0], tb_max)
    return _forward_jit(x, params, tb)


def init_params(key):
    """PyTorch nn.Linear-style init. Weights stored (out, in); biases (out, 1).

    fc4 weight is stored as its transpose (32, 1) for the VPU broadcast-multiply.
    """
    dims = [(IN_DIM, H1), (H1, H2), (H2, H3), (H3, 1)]
    params = []
    for fan_in, fan_out in dims:
        key, kw, kb = jax.random.split(key, 3)
        bound = 1.0 / jnp.sqrt(fan_in)
        w = jax.random.uniform(kw, (fan_out, fan_in), jnp.float32, -bound, bound)
        b = jax.random.uniform(kb, (fan_out, 1), jnp.float32, -bound, bound)
        params.append((w, b))
    (w1, b1), (w2, b2), (w3, b3), (w4, b4) = params
    return [(w1, b1), (w2, b2), (w3, b3), (w4.T, b4)]   # w4 -> (32, 1)


def ref_forward(x, params):
    """Pure-JAX f32 reference matching the PyTorch module."""
    (w1, b1), (w2, b2), (w3, b3), (w4, b4) = params
    h = jnp.maximum(x @ w1.T + b1[:, 0], 0.0)
    h = jnp.maximum(h @ w2.T + b2[:, 0], 0.0)
    h = jnp.maximum(h @ w3.T + b3[:, 0], 0.0)
    z = h @ w4 + b4[0]
    return jax.nn.sigmoid(z)


if __name__ == "__main__":
    key = jax.random.PRNGKey(0)
    key, kx = jax.random.split(key)

    B = 8  # small demo batch -> one right-sized 128-lane tile internally
    x = jax.random.normal(kx, (B, IN_DIM), jnp.float32)
    params = init_params(key)

    out = classification_model_forward(x, params)
    out = jax.block_until_ready(out)

    ref = ref_forward(x, params)

    assert out.shape == (B, 1)
    assert bool(jnp.all((out >= 0.0) & (out <= 1.0)))
    # fc1 runs in f32; only fc2/fc3 use bf16 operands (f32 accumulation), so the
    # deviation from the f32 reference is small.
    assert bool(jnp.allclose(out, ref, atol=2e-2)), (out, ref)
    print("KERNEL_OK")
</pallas_src>

<mosaic_0001>
module attributes {stable_mosaic.version = 11 : i64} {
  func.func @mlp_kernel(%arg0: i32, %arg1: memref<128x22xf32, #tpu.memory_space<vmem>>, %arg2: memref<128x22xf32, #tpu.memory_space<vmem>>, %arg3: memref<128x1xf32, #tpu.memory_space<vmem>>, %arg4: memref<64x128xbf16, #tpu.memory_space<vmem>>, %arg5: memref<64x1xf32, #tpu.memory_space<vmem>>, %arg6: memref<32x64xbf16, #tpu.memory_space<vmem>>, %arg7: memref<32x1xf32, #tpu.memory_space<vmem>>, %arg8: memref<32x1xf32, #tpu.memory_space<vmem>>, %arg9: memref<1x1xf32, #tpu.memory_space<vmem>>, %arg10: memref<1x128xf32, #tpu.memory_space<vmem>>) attributes {dimension_semantics = [#tpu.dimension_semantics<parallel>], iteration_bounds = array<i64: 1>, scalar_prefetch = 0 : i64, scratch_operands = 0 : i64, tpu.core_type = #tpu.core_type<tc>, window_params = [{transform_indices = @transform_0, window_bounds = array<i64: 128, 22>}, {pipeline_mode = #tpu.pipeline_mode<synchronous>, transform_indices = @transform_1, window_bounds = array<i64: 128, 22>}, {pipeline_mode = #tpu.pipeline_mode<synchronous>, transform_indices = @transform_2, window_bounds = array<i64: 128, 1>}, {pipeline_mode = #tpu.pipeline_mode<synchronous>, transform_indices = @transform_3, window_bounds = array<i64: 64, 128>}, {pipeline_mode = #tpu.pipeline_mode<synchronous>, transform_indices = @transform_4, window_bounds = array<i64: 64, 1>}, {pipeline_mode = #tpu.pipeline_mode<synchronous>, transform_indices = @transform_5, window_bounds = array<i64: 32, 64>}, {pipeline_mode = #tpu.pipeline_mode<synchronous>, transform_indices = @transform_6, window_bounds = array<i64: 32, 1>}, {pipeline_mode = #tpu.pipeline_mode<synchronous>, transform_indices = @transform_7, window_bounds = array<i64: 32, 1>}, {pipeline_mode = #tpu.pipeline_mode<synchronous>, transform_indices = @transform_8, window_bounds = array<i64: 1, 1>}, {transform_indices = @transform_9, window_bounds = array<i64: 1, 128>}]} {
    %c0 = arith.constant 0 : index
    %c0_0 = arith.constant 0 : index
    %0 = vector.load %arg2[%c0, %c0_0] : memref<128x22xf32, #tpu.memory_space<vmem>>, vector<128x22xf32>
    %c0_1 = arith.constant 0 : index
    %c0_2 = arith.constant 0 : index
    %1 = vector.load %arg1[%c0_1, %c0_2] : memref<128x22xf32, #tpu.memory_space<vmem>>, vector<128x22xf32>
    %cst = arith.constant dense<0.000000e+00> : vector<128x128xf32>
    %2 = tpu.matmul %0, %1, %cst {dimension_numbers = #tpu.dot_dimension_numbers<[1], [1], [0], [0], [0, 0, 1, 0], [], []>} : vector<128x22xf32>, vector<128x22xf32>, vector<128x128xf32> -> vector<128x128xf32>
    %c0_3 = arith.constant 0 : index
    %c0_4 = arith.constant 0 : index
    %3 = vector.load %arg3[%c0_3, %c0_4] : memref<128x1xf32, #tpu.memory_space<vmem>>, vector<128x1xf32>
    %4 = vector.broadcast %3 : vector<128x1xf32> to vector<128x128xf32>
    %5 = arith.addf %2, %4 : vector<128x128xf32>
    %cst_5 = arith.constant 0.000000e+00 : f32
    %6 = vector.broadcast %cst_5 : f32 to vector<128x128xf32>
    %7 = arith.maximumf %5, %6 : vector<128x128xf32>
    %8 = arith.truncf %7 : vector<128x128xf32> to vector<128x128xbf16>
    %c0_6 = arith.constant 0 : index
    %c0_7 = arith.constant 0 : index
    %9 = vector.load %arg4[%c0_6, %c0_7] : memref<64x128xbf16, #tpu.memory_space<vmem>>, vector<64x128xbf16>
    %cst_8 = arith.constant dense<0.000000e+00> : vector<64x128xf32>
    %10 = tpu.matmul %9, %8, %cst_8 {dimension_numbers = #tpu.dot_dimension_numbers<[1], [0], [0], [1], [0, 0, 1, 1], [], []>} : vector<64x128xbf16>, vector<128x128xbf16>, vector<64x128xf32> -> vector<64x128xf32>
    %c0_9 = arith.constant 0 : index
    %c0_10 = arith.constant 0 : index
    %11 = vector.load %arg5[%c0_9, %c0_10] : memref<64x1xf32, #tpu.memory_space<vmem>>, vector<64x1xf32>
    %12 = vector.broadcast %11 : vector<64x1xf32> to vector<64x128xf32>
    %13 = arith.addf %10, %12 : vector<64x128xf32>
    %cst_11 = arith.constant 0.000000e+00 : f32
    %14 = vector.broadcast %cst_11 : f32 to vector<64x128xf32>
    %15 = arith.maximumf %13, %14 : vector<64x128xf32>
    %16 = arith.truncf %15 : vector<64x128xf32> to vector<64x128xbf16>
    %c0_12 = arith.constant 0 : index
    %c0_13 = arith.constant 0 : index
    %17 = vector.load %arg6[%c0_12, %c0_13] : memref<32x64xbf16, #tpu.memory_space<vmem>>, vector<32x64xbf16>
    %cst_14 = arith.constant dense<0.000000e+00> : vector<32x128xf32>
    %18 = tpu.matmul %17, %16, %cst_14 {dimension_numbers = #tpu.dot_dimension_numbers<[1], [0], [0], [1], [0, 0, 1, 1], [], []>} : vector<32x64xbf16>, vector<64x128xbf16>, vector<32x128xf32> -> vector<32x128xf32>
    %c0_15 = arith.constant 0 : index
    %c0_16 = arith.constant 0 : index
    %19 = vector.load %arg7[%c0_15, %c0_16] : memref<32x1xf32, #tpu.memory_space<vmem>>, vector<32x1xf32>
    %20 = vector.broadcast %19 : vector<32x1xf32> to vector<32x128xf32>
    %21 = arith.addf %18, %20 : vector<32x128xf32>
    %cst_17 = arith.constant 0.000000e+00 : f32
    %22 = vector.broadcast %cst_17 : f32 to vector<32x128xf32>
    %23 = arith.maximumf %21, %22 : vector<32x128xf32>
    %c0_18 = arith.constant 0 : index
    %c0_19 = arith.constant 0 : index
    %24 = vector.load %arg8[%c0_18, %c0_19] : memref<32x1xf32, #tpu.memory_space<vmem>>, vector<32x1xf32>
    %25 = vector.broadcast %24 : vector<32x1xf32> to vector<32x128xf32>
    %26 = arith.mulf %23, %25 : vector<32x128xf32>
    %cst_20 = arith.constant dense<0.000000e+00> : vector<128xf32>
    %27 = vector.multi_reduction <add>, %26, %cst_20 [0] : vector<32x128xf32> to vector<128xf32>
    %28 = vector.shape_cast %27 : vector<128xf32> to vector<1x128xf32>
    %c0_21 = arith.constant 0 : index
    %c0_22 = arith.constant 0 : index
    %29 = vector.load %arg9[%c0_21, %c0_22] : memref<1x1xf32, #tpu.memory_space<vmem>>, vector<1x1xf32>
    %30 = vector.broadcast %29 : vector<1x1xf32> to vector<1x128xf32>
    %31 = arith.addf %28, %30 : vector<1x128xf32>
    %32 = arith.negf %31 : vector<1x128xf32>
    %33 = math.exp %32 : vector<1x128xf32>
    %cst_23 = arith.constant 1.000000e+00 : f32
    %34 = vector.broadcast %cst_23 : f32 to vector<1x128xf32>
    %35 = arith.addf %34, %33 : vector<1x128xf32>
    %36 = arith.divf %34, %35 : vector<1x128xf32>
    %c0_24 = arith.constant 0 : index
    %c0_25 = arith.constant 0 : index
    %37 = vector.load %arg10[%c0_24, %c0_25] : memref<1x128xf32, #tpu.memory_space<vmem>>, vector<1x128xf32>
    tpu.vector_store %arg10[%c0_24, %c0_25], %36 {strides = array<i32>} : memref<1x128xf32, #tpu.memory_space<vmem>>, vector<1x128xf32>,
    return
  }
  func.func @transform_0(%arg0: i32) -> (i32, i32) {
    %c0_i32 = arith.constant 0 : i32
    %c0_i32_0 = arith.constant 0 : i32
    return %arg0, %c0_i32 : i32, i32
  }
  func.func @transform_1(%arg0: i32) -> (i32, i32) {
    %c0_i32 = arith.constant 0 : i32
    %c0_i32_0 = arith.constant 0 : i32
    %c0_i32_1 = arith.constant 0 : i32
    return %c0_i32, %c0_i32_0 : i32, i32
  }
  func.func @transform_2(%arg0: i32) -> (i32, i32) {
    %c0_i32 = arith.constant 0 : i32
    %c0_i32_0 = arith.constant 0 : i32
    %c0_i32_1 = arith.constant 0 : i32
    return %c0_i32, %c0_i32_0 : i32, i32
  }
  func.func @transform_3(%arg0: i32) -> (i32, i32) {
    %c0_i32 = arith.constant 0 : i32
    %c0_i32_0 = arith.constant 0 : i32
    %c0_i32_1 = arith.constant 0 : i32
    return %c0_i32, %c0_i32_0 : i32, i32
  }
  func.func @transform_4(%arg0: i32) -> (i32, i32) {
    %c0_i32 = arith.constant 0 : i32
    %c0_i32_0 = arith.constant 0 : i32
    %c0_i32_1 = arith.constant 0 : i32
    return %c0_i32, %c0_i32_0 : i32, i32
  }
  func.func @transform_5(%arg0: i32) -> (i32, i32) {
    %c0_i32 = arith.constant 0 : i32
    %c0_i32_0 = arith.constant 0 : i32
    %c0_i32_1 = arith.constant 0 : i32
    return %c0_i32, %c0_i32_0 : i32, i32
  }
  func.func @transform_6(%arg0: i32) -> (i32, i32) {
    %c0_i32 = arith.constant 0 : i32
    %c0_i32_0 = arith.constant 0 : i32
    %c0_i32_1 = arith.constant 0 : i32
    return %c0_i32, %c0_i32_0 : i32, i32
  }
  func.func @transform_7(%arg0: i32) -> (i32, i32) {
    %c0_i32 = arith.constant 0 : i32
    %c0_i32_0 = arith.constant 0 : i32
    %c0_i32_1 = arith.constant 0 : i32
    return %c0_i32, %c0_i32_0 : i32, i32
  }
  func.func @transform_8(%arg0: i32) -> (i32, i32) {
    %c0_i32 = arith.constant 0 : i32
    %c0_i32_0 = arith.constant 0 : i32
    %c0_i32_1 = arith.constant 0 : i32
    return %c0_i32, %c0_i32_0 : i32, i32
  }
  func.func @transform_9(%arg0: i32) -> (i32, i32) {
    %c0_i32 = arith.constant 0 : i32
    %c0_i32_0 = arith.constant 0 : i32
    return %c0_i32, %arg0 : i32, i32
  }
}

</mosaic_0001>

<bundles_post_ra>
// kernel: _forward_jit.1
= control target key start
LH: loop header
LB: loop body
LE: loop exit
PB: predicated region body
PF: predicated region fallthrough
CT: control target
= control target key end

     0   :  { %vm163_vm0 = vcmask 179200   ;;  %v939_v2 = vmov 0   ;;  %vm624_vm1 = vcmask 523264   ;;  %s1265_s0 = inlined_call_operand.vmem [shape: f32[128,22], index: 0, kind: input, shape index: {}]   ;;  %s1266_s8 = inlined_call_operand.<no memory space> [shape: f32[1,1], index: 8, kind: input, shape index: {}]   ;;  %s1267_s1 = inlined_call_operand.vmem [shape: f32[128,22], index: 1, kind: input, shape index: {}]   ;;  %s1268_s2 = inlined_call_operand.vmem [shape: f32[128,1], index: 2, kind: input, shape index: {}]   ;;  %s1269_s4 = inlined_call_operand.vmem [shape: f32[64,1], index: 4, kind: input, shape index: {}]   ;;  %s1270_s6 = inlined_call_operand.vmem [shape: f32[32,1], index: 6, kind: input, shape index: {}]   ;;  %s1271_s7 = inlined_call_operand.vmem [shape: f32[32,1], index: 7, kind: input, shape index: {}]   ;;  %s1272_s3 = inlined_call_operand.vmem [shape: bf16[64,128], index: 3, kind: input, shape index: {}]   ;;  %s1273_s5 = inlined_call_operand.vmem [shape: bf16[32,64], index: 5, kind: input, shape index: {}]   ;;  %s1274_s9 = inlined_call_operand.vmem [shape: f32[1,128], index: 9, kind: output, shape index: {}]  }
   0x1   :  { %v66_v0 = vld [vmem:[%s1265_s0 + $0x78] sm:$0xff]  ;;  %v65_v1 = vld [vmem:[%s1265_s0 + $0x70] sm:$0xff]  ;;  %927 = vset.pattern.permute.xlu0 %v939_v2  ;;  %928 = vset.pattern.permute.xlu1 %v939_v2  ;;  %v14_v3 = vstv %s1266_s8  ;;  %v64_v4 = vld [vmem:[%s1265_s0 + $0x68] sm:$0xff] }
   0x2   :  { %834 = vmatprep.subr.msk.mxu0 %vm163_vm0, %v66_v0  ;;  %15 = vst [vmem:[#allocation2] sm:$0x1] %v14_v3  ;;  %v35_v5 = vld [vmem:[%s1267_s1] sm:$0xff]  ;;  %v81_v7 = vld [vmem:[%s1268_s2 + $0x70] sm:$0xff]  ;;  %v62_v9 = vld [vmem:[%s1265_s0 + $0x58] sm:$0xff] }
   0x3   :  { %835 = vmatpush3.xpose.msk.msra.mxu0 %vm163_vm0, %v66_v0  ;;  %866 = vmatprep.mubr.msk.f32.mxu0 %vm163_vm0, %v35_v5  ;;  %v63_v6 = vld [vmem:[%s1265_s0 + $0x60] sm:$0xff]  ;;  %v82_v10 = vld [vmem:[%s1268_s2 + $0x78] sm:$0xff]  ;;  %v80_v11 = vld [vmem:[%s1268_s2 + $0x68] sm:$0xff] }
   0x4   :  { %836 = vmatprep.subr.msk.mxu0 %vm163_vm0, %v65_v1  ;;  %155 = vperm.xlu0 %927, %v81_v7   ;;  %v79_v8 = vld [vmem:[%s1268_s2 + $0x60] sm:$0xff]  ;;  %v61_v12 = vld [vmem:[%s1265_s0 + $0x50] sm:$0xff]  ;;  %v78_v14 = vld [vmem:[%s1268_s2 + $0x58] sm:$0xff] }
   0x5   :  { %145 = vperm.xlu1 %928, %v79_v8   ;;  %v77_v13 = vld [vmem:[%s1268_s2 + $0x50] sm:$0xff]  ;;  %v60_v15 = vld [vmem:[%s1265_s0 + $0x48] sm:$0xff]  ;;  %v75_v16 = vld [vmem:[%s1268_s2 + $0x40] sm:$0xff] }
   0x6   :  { %v76_v17 = vld [vmem:[%s1268_s2 + $0x48] sm:$0xff]  ;;  %v59_v18 = vld [vmem:[%s1265_s0 + $0x40] sm:$0xff]  ;;  %v73_v19 = vld [vmem:[%s1268_s2 + $0x30] sm:$0xff] }
   0x7   :  { %837 = vmatpush3.xpose.msk.msra.mxu0 %vm163_vm0, %v65_v1  ;;  %v74_v20 = vld [vmem:[%s1268_s2 + $0x38] sm:$0xff]  ;;  %v71_v22 = vld [vmem:[%s1268_s2 + $0x20] sm:$0xff]  ;;  %v72_v23 = vld [vmem:[%s1268_s2 + $0x28] sm:$0xff] }
   0x8   :  { %838 = vmatprep.subr.msk.mxu0 %vm163_vm0, %v64_v4  ;;  %160 = vperm.xlu0 %927, %v82_v10   ;;  %v58_v21 = vld [vmem:[%s1265_s0 + $0x38] sm:$0xff]  ;;  %v57_v24 = vld [vmem:[%s1265_s0 + $0x30] sm:$0xff]  ;;  %v56_v27 = vld [vmem:[%s1265_s0 + $0x28] sm:$0xff] }
   0x9   :  { %150 = vperm.xlu1 %928, %v80_v11   ;;  %v69_v25 = vld [vmem:[%s1268_s2 + $0x10] sm:$0xff]  ;;  %v70_v26 = vld [vmem:[%s1268_s2 + $0x18] sm:$0xff]  ;;  %v67_v28 = vld [vmem:[%s1268_s2] sm:$0xff] }
   0xa   :  { %v68_v29 = vld [vmem:[%s1268_s2 + $0x8] sm:$0xff]  ;;  %v55_v30 = vld [vmem:[%s1265_s0 + $0x20] sm:$0xff]  ;;  %v443_v31 = vld [vmem:[%s1269_s4 + $0x30] sm:$0xff] }
   0xb   :  { %839 = vmatpush3.xpose.msk.msra.mxu0 %vm163_vm0, %v64_v4  ;;  %v444_v32 = vld [vmem:[%s1269_s4 + $0x38] sm:$0xff]  ;;  %v441_v34 = vld [vmem:[%s1269_s4 + $0x20] sm:$0xff]  ;;  %v442_v35 = vld [vmem:[%s1269_s4 + $0x28] sm:$0xff] }
   0xc   :  { %840 = vmatprep.subr.msk.mxu0 %vm163_vm0, %v63_v6  ;;  %135 = vperm.xlu0 %927, %v77_v13   ;;  %v54_v33 = vld [vmem:[%s1265_s0 + $0x18] sm:$0xff]  ;;  %v53_v36 = vld [vmem:[%s1265_s0 + $0x10] sm:$0xff]  ;;  %v52_v39 = vld [vmem:[%s1265_s0 + $0x8] sm:$0xff] }
   0xd   :  { %140 = vperm.xlu1 %928, %v78_v14   ;;  %v439_v37 = vld [vmem:[%s1269_s4 + $0x10] sm:$0xff]  ;;  %v440_v38 = vld [vmem:[%s1269_s4 + $0x18] sm:$0xff]  ;;  %v437_v40 = vld [vmem:[%s1269_s4] sm:$0xff] }
   0xe   :  { %v438_v41 = vld [vmem:[%s1269_s4 + $0x8] sm:$0xff]  ;;  %v51_v42 = vld [vmem:[%s1265_s0] sm:$0xff]  ;;  %v592_v45 = vld [vmem:[%s1270_s6 + $0x10] sm:$0xff] }
   0xf   :  { %841 = vmatpush3.xpose.msk.msra.mxu0 %vm163_vm0, %v63_v6  ;;  %v590_v43 = vld [vmem:[%s1270_s6] sm:$0xff]  ;;  %v591_v44 = vld [vmem:[%s1270_s6 + $0x8] sm:$0xff]  ;;  %v593_v46 = vld [vmem:[%s1270_s6 + $0x18] sm:$0xff] }
  0x10   :  { %842 = vmatprep.subr.msk.mxu0 %vm163_vm0, %v62_v9  ;;  %125 = vperm.xlu0 %927, %v75_v16   ;;  %v36_v47 = vld [vmem:[%s1267_s1 + $0x8] sm:$0xff]  ;;  %v37_v48 = vld [vmem:[%s1267_s1 + $0x10] sm:$0xff]  ;;  %v684_v49 = vld [vmem:[%s1271_s7] sm:$0xff] }
  0x11   :  { %130 = vperm.xlu1 %928, %v76_v17   ;;  %v685_v50 = vld [vmem:[%s1271_s7 + $0x8] sm:$0xff]  ;;  %v38_v51 = vld [vmem:[%s1267_s1 + $0x18] sm:$0xff]  ;;  %v39_v52 = vld [vmem:[%s1267_s1 + $0x20] sm:$0xff] }
  0x12   :  { %v686_v53 = vld [vmem:[%s1271_s7 + $0x10] sm:$0xff]  ;;  %v687_v54 = vld [vmem:[%s1271_s7 + $0x18] sm:$0xff]  ;;  %v40_v55 = vld [vmem:[%s1267_s1 + $0x28] sm:$0xff] }
  0x13   :  { %843 = vmatpush3.xpose.msk.msra.mxu0 %vm163_vm0, %v62_v9  ;;  %v41_v56 = vld [vmem:[%s1267_s1 + $0x30] sm:$0xff]  ;;  %v721_v57 = vld [vmem:[#allocation2] sm:$0x1]  ;;  %v42_v58 = vld [vmem:[%s1267_s1 + $0x38] sm:$0xff] }
  0x14   :  { %844 = vmatprep.subr.msk.mxu0 %vm163_vm0, %v61_v12  ;;  %115 = vperm.xlu0 %927, %v73_v19   ;;  %v43_v59 = vld [vmem:[%s1267_s1 + $0x40] sm:$0xff]  ;;  %v44_v60 = vld [vmem:[%s1267_s1 + $0x48] sm:$0xff]  ;;  %v45_v61 = vld [vmem:[%s1267_s1 + $0x50] sm:$0xff] }
  0x15   :  { %120 = vperm.xlu1 %928, %v74_v20   ;;  %v46_v62 = vld [vmem:[%s1267_s1 + $0x58] sm:$0xff]  ;;  %v47_v63 = vld [vmem:[%s1267_s1 + $0x60] sm:$0xff]  ;;  %v48_v0 = vld [vmem:[%s1267_s1 + $0x68] sm:$0xff] }
  0x16   :  { %v49_v1 = vld [vmem:[%s1267_s1 + $0x70] sm:$0xff]  ;;  %v50_v2 = vld [vmem:[%s1267_s1 + $0x78] sm:$0xff]  ;;  %v929_v3 = vld [vmem:[%s1272_s3] sm:$0xff]  }
  0x17   :  { %845 = vmatpush3.xpose.msk.msra.mxu0 %vm163_vm0, %v61_v12  ;;  %906 = vmatprep.mubr.bf16.mxu1 %v929_v3 }
  0x18   :  { %846 = vmatprep.subr.msk.mxu0 %vm163_vm0, %v60_v15  ;;  %105 = vperm.xlu0 %927, %v71_v22  }
  0x19   :  { %110 = vperm.xlu1 %928, %v72_v23  }
  0x1b   :  { %847 = vmatpush3.xpose.msk.msra.mxu0 %vm163_vm0, %v60_v15 }
  0x1c   :  { %848 = vmatprep.subr.msk.mxu0 %vm163_vm0, %v59_v18  ;;  %95 = vperm.xlu0 %927, %v69_v25  }
  0x1d   :  { %100 = vperm.xlu1 %928, %v70_v26  }
  0x1f   :  { %849 = vmatpush3.xpose.msk.msra.mxu0 %vm163_vm0, %v59_v18 }
  0x20   :  { %850 = vmatprep.subr.msk.mxu0 %vm163_vm0, %v58_v21  ;;  %85 = vperm.xlu0 %927, %v67_v28  }
  0x21   :  { %90 = vperm.xlu1 %928, %v68_v29  }
  0x23   :  { %851 = vmatpush3.xpose.msk.msra.mxu0 %vm163_vm0, %v58_v21 }
  0x24   :  { %852 = vmatprep.subr.msk.mxu0 %vm163_vm0, %v57_v24  ;;  %477 = vperm.xlu0 %927, %v443_v31  }
  0x25   :  { %482 = vperm.xlu1 %928, %v444_v32  }
  0x27   :  { %853 = vmatpush3.xpose.msk.msra.mxu0 %vm163_vm0, %v57_v24 }
  0x28   :  { %854 = vmatprep.subr.msk.mxu0 %vm163_vm0, %v56_v27  ;;  %467 = vperm.xlu0 %927, %v441_v34  }
  0x29   :  { %472 = vperm.xlu1 %928, %v442_v35  }
  0x2b   :  { %855 = vmatpush3.xpose.msk.msra.mxu0 %vm163_vm0, %v56_v27 }
  0x2c   :  { %856 = vmatprep.subr.msk.mxu0 %vm163_vm0, %v55_v30  ;;  %457 = vperm.xlu0 %927, %v439_v37  }
  0x2d   :  { %462 = vperm.xlu1 %928, %v440_v38  }
  0x2f   :  { %857 = vmatpush3.xpose.msk.msra.mxu0 %vm163_vm0, %v55_v30 }
  0x30   :  { %858 = vmatprep.subr.msk.mxu0 %vm163_vm0, %v54_v33  ;;  %447 = vperm.xlu0 %927, %v437_v40  }
  0x31   :  { %452 = vperm.xlu1 %928, %v438_v41  }
  0x33   :  { %859 = vmatpush3.xpose.msk.msra.mxu0 %vm163_vm0, %v54_v33 }
  0x34   :  { %860 = vmatprep.subr.msk.mxu0 %vm163_vm0, %v53_v36  ;;  %596 = vperm.xlu0 %927, %v590_v43  }
  0x35   :  { %601 = vperm.xlu1 %928, %v591_v44  }
  0x37   :  { %861 = vmatpush3.xpose.msk.msra.mxu0 %vm163_vm0, %v53_v36 }
  0x38   :  { %862 = vmatprep.subr.msk.mxu0 %vm163_vm0, %v52_v39  ;;  %606 = vperm.xlu0 %927, %v592_v45  }
  0x39   :  { %611 = vperm.xlu1 %928, %v593_v46  }
  0x3b   :  { %863 = vmatpush3.xpose.msk.msra.mxu0 %vm163_vm0, %v52_v39 }
  0x3c   :  { %864 = vmatprep.subr.msk.mxu0 %vm163_vm0, %v51_v42  ;;  %690 = vperm.xlu0 %927, %v684_v49  }
  0x3d   :  { %695 = vperm.xlu1 %928, %v685_v50  }
  0x3f   :  { %865 = vmatpush3.xpose.msk.msra.mxu0 %vm163_vm0, %v51_v42 }
  0x40   :  { %700 = vperm.xlu0 %927, %v686_v53  }
  0x41   :  { %705 = vperm.xlu1 %928, %v687_v54  }
  0x42   :  { %867 = vmatmul.mubr.msk.f32.vlgmr.msra.gmra.mxu0 %vm163_vm0, %v36_v47 }
  0x43   :  { %869 = vmatprep.mubr.msk.f32.mxu0 %vm163_vm0, %v37_v48 }
  0x44   :  { %724 = vperm.xlu0 %927, %v721_v57  }
  0x46   :  { %870 = vmatmul.mubr.msk.f32.gmra.mxu0 %vm163_vm0, %v38_v51 }
  0x47   :  { %872 = vmatprep.mubr.msk.f32.mxu0 %vm163_vm0, %v39_v52 }
  0x4a   :  { %873 = vmatmul.mubr.msk.f32.gmra.mxu0 %vm163_vm0, %v40_v55 }
  0x4b   :  { %875 = vmatprep.mubr.msk.f32.mxu0 %vm163_vm0, %v41_v56 }
  0x4e   :  { %876 = vmatmul.mubr.msk.f32.gmra.mxu0 %vm163_vm0, %v42_v58 }
  0x4f   :  { %878 = vmatprep.mubr.msk.f32.mxu0 %vm163_vm0, %v43_v59 }
  0x52   :  { %879 = vmatmul.mubr.msk.f32.gmra.mxu0 %vm163_vm0, %v44_v60 }
  0x53   :  { %881 = vmatprep.mubr.msk.f32.mxu0 %vm163_vm0, %v45_v61 }
  0x56   :  { %882 = vmatmul.mubr.msk.f32.gmra.mxu0 %vm163_vm0, %v46_v62 }
  0x57   :  { %884 = vmatprep.mubr.msk.f32.mxu0 %vm163_vm0, %v47_v63 }
  0x5a   :  { %885 = vmatmul.mubr.msk.f32.gmra.mxu0 %vm163_vm0, %v48_v0 }
  0x5b   :  { %887 = vmatprep.mubr.msk.f32.mxu0 %vm163_vm0, %v49_v1 }
  0x5e   :  { %888 = vmatmul.mubr.msk.f32.gmra.mxu0 %vm163_vm0, %v50_v2 }
  0x7f   :  { %v156_v9 = vpop.permute.xlu0 %155 }
  0x80   :  { %v146_v11 = vpop.permute.xlu1 %145 }
  0x83   :  { %v161_v14 = vpop.permute.xlu0 %160 }
  0x84   :  { %v151_v16 = vpop.permute.xlu1 %150 }
  0x87   :  { %v136_v19 = vpop.permute.xlu0 %135 }
  0x88   :  { %v141_v21 = vpop.permute.xlu1 %140 }
  0x8b   :  { %v126_v24 = vpop.permute.xlu0 %125 }
  0x8c   :  { %v131_v28 = vpop.permute.xlu1 %130 }
  0x8f   :  { %v116_v36 = vpop.permute.xlu0 %115 }
  0x90   :  { %v121_v40 = vpop.permute.xlu1 %120 }
  0x93   :  { %v106_v46 = vpop.permute.xlu0 %105 }
  0x94   :  { %v111_v50 = vpop.permute.xlu1 %110 }
  0x97   :  { %v96_v56 = vpop.permute.xlu0 %95 }
  0x98   :  { %v101_v59 = vpop.permute.xlu1 %100 }
  0x9b   :  { %v86_v1 = vpop.permute.xlu0 %85 }
 0x102   :  { %v1236_v4 = vpop.f32.mrf.mxu0 }
 0x104   :  { %v1238_v5 = vpop.f32.mrf.mxu0 }
 0x105   :  { %v327_v2 = vadd.f32 %v1238_v5, %v86_v1  ;;  %v930_v5 = vld [vmem:[%s1272_s3 + $0x8] sm:$0xff]  }
 0x106   :  { %v1240_v6 = vpop.f32.mrf.mxu0 }
 0x107   :  { %v342_v63 = vadd.f32 %v1240_v6, %v101_v59  ;;  %v931_v6 = vld [vmem:[%s1272_s3 + $0x10] sm:$0xff]  }
 0x108   :  { %v336_v7 = vpop.f32.mrf.mxu0 }
 0x109   :  { %v337_v60 = vadd.f32 %v336_v7, %v96_v56 }
 0x10a   :  { %v874_v8 = vpop.f32.mrf.mxu0 }
 0x10b   :  { %v352_v57 = vadd.f32 %v874_v8, %v111_v50  ;;  %v407_v3 = vmax.f32 %v337_v60, 0.0 }
 0x10c   :  { %v346_v10 = vpop.f32.mrf.mxu0 }
 0x10d   :  { %v347_v53 = vadd.f32 %v346_v10, %v106_v46  ;;  %v410_v0 = vmax.f32 %v352_v57, 0.0  ;;  %v91_v10 = vpop.permute.xlu1 %90 }
 0x10e   :  { %v877_v12 = vpop.f32.mrf.mxu0  ;;  %v332_v8 = vadd.f32 %v1236_v4, %v91_v10  ;;  %v932_v4 = vld [vmem:[%s1272_s3 + $0x18] sm:$0xff]  }
 0x10f   :  { %v362_v51 = vadd.f32 %v877_v12, %v121_v40  ;;  %v409_v61 = vmax.f32 %v347_v53, 0.0  ;;  %v405_v12 = vmax.f32 %v327_v2, 0.0 }
 0x110   :  { %v356_v13 = vpop.f32.mrf.mxu0 }
 0x111   :  { %v357_v47 = vadd.f32 %v356_v13, %v116_v36  ;;  %v412_v58 = vmax.f32 %v362_v51, 0.0  ;;  %v406_v13 = vmax.f32 %v332_v8, 0.0 }
 0x112   :  { %v880_v15 = vpop.f32.mrf.mxu0 }
 0x113   :  { %v372_v44 = vadd.f32 %v880_v15, %v131_v28  ;;  %v411_v54 = vmax.f32 %v357_v47, 0.0  ;;  %v933_v15 = vld [vmem:[%s1273_s5] sm:$0xff]  }
 0x114   :  { %v366_v17 = vpop.f32.mrf.mxu0 }
 0x115   :  { %v367_v41 = vadd.f32 %v366_v17, %v126_v24  ;;  %v414_v52 = vmax.f32 %v372_v44, 0.0  ;;  %v424_v62 = vpack.c.bf16 %v412_v58, %v411_v54 }
 0x116   :  { %v883_v18 = vpop.f32.mrf.mxu0 }
 0x117   :  { %v382_v37 = vadd.f32 %v883_v18, %v141_v21  ;;  %v413_v48 = vmax.f32 %v367_v41, 0.0  ;;  %v478_v18 = vpop.permute.xlu0 %477 }
 0x118   :  { %v376_v20 = vpop.f32.mrf.mxu0 }
 0x119   :  { %v377_v32 = vadd.f32 %v376_v20, %v136_v19  ;;  %v416_v45 = vmax.f32 %v382_v37, 0.0  ;;  %v425_v55 = vpack.c.bf16 %v414_v52, %v413_v48  ;;  %v934_v52 = vld [vmem:[%s1273_s5 + $0x8] sm:$0xff]  }
 0x11a   :  { %v886_v22 = vpop.f32.mrf.mxu0 }
 0x11b   :  { %v392_v30 = vadd.f32 %v886_v22, %v151_v16  ;;  %v415_v42 = vmax.f32 %v377_v32, 0.0  ;;  %v483_v16 = vpop.permute.xlu1 %482 }
 0x11c   :  { %v386_v23 = vpop.f32.mrf.mxu0 }
 0x11d   :  { %v387_v26 = vadd.f32 %v386_v23, %v146_v11  ;;  %v418_v38 = vmax.f32 %v392_v30, 0.0  ;;  %v426_v49 = vpack.c.bf16 %v416_v45, %v415_v42  ;;  %v408_v11 = vmax.f32 %v342_v63, 0.0  ;;  %v468_v23 = vpop.permute.xlu0 %467 }
 0x11e   :  { %v889_v25 = vpop.f32.mrf.mxu0 }
 0x11f   :  { %v402_v27 = vadd.f32 %v889_v25, %v161_v14  ;;  %v417_v33 = vmax.f32 %v387_v26, 0.0  ;;  %v422_v7 = vpack.c.bf16 %v408_v11, %v407_v3  ;;  %v421_v14 = vpack.c.bf16 %v406_v13, %v405_v12  ;;  %v473_v21 = vpop.permute.xlu1 %472 }
 0x120   :  { %v396_v29 = vpop.f32.mrf.mxu0 }
 0x121   :  { %v397_v31 = vadd.f32 %v396_v29, %v156_v9  ;;  %v420_v34 = vmax.f32 %v402_v27, 0.0  ;;  %v427_v43 = vpack.c.bf16 %v418_v38, %v417_v33  ;;  %v423_v9 = vpack.c.bf16 %v410_v0, %v409_v61 }
 0x123   :  { %v419_v35 = vmax.f32 %v397_v31, 0.0  ;;  %v463_v27 = vpop.permute.xlu1 %462  ;;  %v458_v31 = vpop.permute.xlu0 %457 }
 0x125   :  { %v428_v39 = vpack.c.bf16 %v420_v34, %v419_v35 }
 0x127   :  { %890 = vmatprep.subr.bf16.mxu1 %v428_v39  ;;  %v453_v41 = vpop.permute.xlu1 %452  ;;  %v448_v45 = vpop.permute.xlu0 %447 }
 0x128   :  { %891 = vmatpush3.bf16.msra.mxu1 %v428_v39 }
 0x129   :  { %892 = vmatprep.subr.bf16.mxu1 %v427_v43 }
 0x12b   :  { %v597_v53 = vpop.permute.xlu0 %596  ;;  %v602_v54 = vpop.permute.xlu1 %601 }
 0x12c   :  { %893 = vmatpush3.bf16.msra.mxu1 %v427_v43 }
 0x12d   :  { %894 = vmatprep.subr.bf16.mxu1 %v426_v49 }
 0x12f   :  { %v612_v57 = vpop.permute.xlu1 %611 }
 0x130   :  { %895 = vmatpush3.bf16.msra.mxu1 %v426_v49 }
 0x131   :  { %896 = vmatprep.subr.bf16.mxu1 %v425_v55 }
 0x133   :  { %v696_v3 = vpop.permute.xlu1 %695 }
 0x134   :  { %897 = vmatpush3.bf16.msra.mxu1 %v425_v55  ;;  %v607_v55 = vpop.permute.xlu0 %606 }
 0x135   :  { %898 = vmatprep.subr.bf16.mxu1 %v424_v62 }
 0x138   :  { %899 = vmatpush3.bf16.msra.mxu1 %v424_v62  ;;  %v691_v62 = vpop.permute.xlu0 %690 }
 0x139   :  { %900 = vmatprep.subr.bf16.mxu1 %v423_v9 }
 0x13c   :  { %901 = vmatpush3.bf16.msra.mxu1 %v423_v9 }
 0x13d   :  { %902 = vmatprep.subr.bf16.mxu1 %v422_v7 }
 0x140   :  { %903 = vmatpush3.bf16.msra.mxu1 %v422_v7  ;;  %v701_v7 = vpop.permute.xlu0 %700 }
 0x141   :  { %904 = vmatprep.subr.bf16.mxu1 %v421_v14 }
 0x144   :  { %905 = vmatpush3.bf16.msra.mxu1 %v421_v14 }
 0x147   :  { %907 = vmatmul.mubr.bf16.vlgmr.msra.gmra.mxu1 %v930_v5  ;;  %v706_v5 = vpop.permute.xlu1 %705 }
 0x148   :  { %910 = vmatprep.mubr.bf16.mxu1 %v931_v6 }
 0x14f   :  { %911 = vmatmul.mubr.bf16.gmra.mxu1 %v932_v4 }
 0x150   :  { %922 = vmatprep.mubr.msk.bf16.mxu1 %vm624_vm1, %v933_v15  ;;  %v727_v15 = vlaneseq }
 0x207   :  { %v908_v17 = vpop.f32.mrf.mxu1 }
 0x208   :  { %v552_v37 = vadd.f32 %v908_v17, %v458_v31 }
 0x209   :  { %v543_v19 = vpop.f32.mrf.mxu1 }
 0x20a   :  { %v576_v46 = vmax.f32 %v552_v37, 0.0  ;;  %v544_v47 = vadd.f32 %v543_v19, %v448_v45 }
 0x20b   :  { %v909_v20 = vpop.f32.mrf.mxu1 }
 0x20c   :  { %v555_v33 = vadd.f32 %v909_v20, %v463_v27  ;;  %v574_v50 = vmax.f32 %v544_v47, 0.0 }
 0x20d   :  { %v546_v22 = vpop.f32.mrf.mxu1 }
 0x20e   :  { %v577_v42 = vmax.f32 %v555_v33, 0.0  ;;  %v547_v43 = vadd.f32 %v546_v22, %v453_v41 }
 0x20f   :  { %v912_v24 = vpop.f32.mrf.mxu1 }
 0x210   :  { %v568_v26 = vadd.f32 %v912_v24, %v478_v18  ;;  %v583_v48 = vpack.c.bf16 %v577_v42, %v576_v46  ;;  %v575_v49 = vmax.f32 %v547_v43, 0.0  ;;  %v728_v18 = vshrl.u32 %v727_v15, 7 }
 0x211   :  { %v559_v25 = vpop.f32.mrf.mxu1 }
 0x212   :  { %v560_v29 = vadd.f32 %v559_v25, %v468_v23  ;;  %v580_v34 = vmax.f32 %v568_v26, 0.0  ;;  %v582_v51 = vpack.c.bf16 %v575_v49, %v574_v50  ;;  %v725_v23 = vpop.permute.xlu0 %724 }
 0x213   :  { %v913_v28 = vpop.f32.mrf.mxu1 }
 0x214   :  { %v571_v30 = vadd.f32 %v913_v28, %v483_v16  ;;  %v578_v38 = vmax.f32 %v560_v29, 0.0 }
 0x215   :  { %v562_v32 = vpop.f32.mrf.mxu1 }
 0x216   :  { %v581_v35 = vmax.f32 %v571_v30, 0.0  ;;  %v563_v36 = vadd.f32 %v562_v32, %v473_v21  ;;  %v729_v21 = vsub.s32 0, %v728_v18 }
 0x218   :  { %v585_v39 = vpack.c.bf16 %v581_v35, %v580_v34  ;;  %v579_v40 = vmax.f32 %v563_v36, 0.0  ;;  %v730_v25 = vrot.slane %v725_v23, %v729_v21 }
 0x21a   :  { %v584_v44 = vpack.c.bf16 %v579_v40, %v578_v38  ;;  %914 = vmatprep.subr.bf16.mxu1 %v585_v39 }
 0x21b   :  { %915 = vmatpush3.bf16.msra.mxu1 %v585_v39 }
 0x21c   :  { %916 = vmatprep.subr.bf16.mxu1 %v584_v44 }
 0x21f   :  { %917 = vmatpush3.bf16.msra.mxu1 %v584_v44 }
 0x220   :  { %918 = vmatprep.subr.bf16.mxu1 %v583_v48 }
 0x223   :  { %919 = vmatpush3.bf16.msra.mxu1 %v583_v48 }
 0x224   :  { %920 = vmatprep.subr.bf16.mxu1 %v582_v51 }
 0x227   :  { %921 = vmatpush3.bf16.msra.mxu1 %v582_v51 }
 0x22a   :  { %923 = vmatmul.mubr.msk.bf16.vlgmr.msra.gmra.mxu1 %vm624_vm1, %v934_v52 }
 0x2ea   :  { %v924_v56 = vpop.f32.mrf.mxu1 }
 0x2eb   :  { %v674_v61 = vadd.f32 %v924_v56, %v607_v55 }
 0x2ec   :  { %v665_v58 = vpop.f32.mrf.mxu1 }
 0x2ed   :  { %v666_v59 = vadd.f32 %v665_v58, %v597_v53  ;;  %v682_v9 = vmax.f32 %v674_v61, 0.0 }
 0x2ee   :  { %v925_v60 = vpop.f32.mrf.mxu1 }
 0x2ef   :  { %v680_v0 = vmax.f32 %v666_v59, 0.0  ;;  %v677_v1 = vadd.f32 %v925_v60, %v612_v57  ;;  %v710_v13 = vmul.f32 %v701_v7, %v682_v9 }
 0x2f0   :  { %v668_v63 = vpop.f32.mrf.mxu1 }
 0x2f1   :  { %v669_v2 = vadd.f32 %v668_v63, %v602_v54  ;;  %v708_v8 = vmul.f32 %v691_v62, %v680_v0  ;;  %v683_v11 = vmax.f32 %v677_v1, 0.0 }
 0x2f3   :  { %v681_v10 = vmax.f32 %v669_v2, 0.0  ;;  %v711_v6 = vmul.f32 %v706_v5, %v683_v11 }
 0x2f5   :  { %v709_v12 = vmul.f32 %v696_v3, %v681_v10 }
 0x2f7   :  { %v712_v14 = vadd.f32 %v709_v12, %v708_v8 }
 0x2f9   :  { %v713_v4 = vadd.f32 %v712_v14, %v710_v13 }
 0x2fb   :  { %v714_v16 = vadd.f32 %v713_v4, %v711_v6 }
 0x2fd   :  { %v715_v17 = vrot.slane %v714_v16, 4 }
 0x2ff   :  { %v716_v19 = vadd.f32 %v715_v17, %v714_v16 }
 0x301   :  { %v717_v20 = vrot.slane %v716_v19, 2 }
 0x303   :  { %v718_v22 = vadd.f32 %v717_v20, %v716_v19 }
 0x305   :  { %v719_v24 = vrot.slane %v718_v22, 1 }
 0x307   :  { %v720_v26 = vadd.f32 %v719_v24, %v718_v22 }
 0x309   :  { %v731_v27 = vadd.f32 %v730_v25, %v720_v26 }
 0x30b   :  { %v783_v28 = vmul.f32 -1.442695, %v731_v27 }
 0x30d   :  { %935 = vpow2.f32 %v783_v28 }
 0x31a   :  { %v936_v29 = vpop.eup %935 }
 0x31b   :  { %v735_v30 = vadd.f32 1.0, %v936_v29 }
 0x31d   :  { %937 = vrcp.f32 %v735_v30 }
 0x32a   :  { %v938_v31 = vpop.eup %937 }
 0x32b   :  { %738 = vst [vmem:[%s1274_s9] sm:$0x1] %v938_v31 }

</bundles_post_ra>
